<compile_context>
chip_gen: v5e
topology: v5e:2x2
jax: 0.10.0
libtpu: 0.0.40
codegen_flags: <defaults>
</compile_context>

<pallas_src>
import math

import jax
import jax.numpy as jnp
from jax.experimental import pallas as pl
from jax.experimental.pallas import tpu as pltpu


def _round_up(x: int, m: int) -> int:
    return ((x + m - 1) // m) * m


def _cdiv(a: int, b: int) -> int:
    return (a + b - 1) // b


def _vmem_budget_bytes() -> int:
    """~75% of physical VMEM: ~48 MiB on v7x, ~96 MiB on v5e/v6e."""
    try:
        cap = int(pltpu.get_tpu_info().vmem_capacity_bytes)
    except Exception:
        cap = 64 << 20          # conservative fallback (v7x physical size)
    return min((cap * 3) // 4, 100 << 20)


def _choose_tiling(n_nodes: int, tm_max: int, tk_max: int):
    """Tile sizes / padded extents; deterministic in (n_nodes, tm_max, tk_max)."""
    n128 = _round_up(n_nodes, 128)
    # Reduction (K) axis: split the 128-padded extent evenly into tiles of at
    # most tk_max, so we never stream a nearly-all-zero extra adjacency tile.
    k_tiles = max(1, _cdiv(n128, tk_max))
    tk = _round_up(_cdiv(n128, k_tiles), 128)
    n_cols = k_tiles * tk
    # Row (M) axis: same, but keep >=2 (even) row tiles when N allows so the
    # "parallel" axis can shard across both TensorCores on v7x.
    m_tiles = max(1, _cdiv(n_nodes, tm_max))
    if n_nodes >= 256:
        m_tiles = max(m_tiles, 2)
        if m_tiles % 2:
            m_tiles += 1
    tm = _round_up(_cdiv(n_nodes, m_tiles), 64)   # 64 covers f32/bf16/fp8 sublane packing
    n_rows = m_tiles * tm
    return tm, tk, m_tiles, k_tiles, n_rows, n_cols


def prepare_adjacency(adj, *, stream_dtype=jnp.bfloat16,
                      tm_max: int = 1024, tk_max: int = 2048):
    """Pad + cast the dense adjacency ONCE; reuse the result across layers.

    Passing the returned array to graph_convolution (with matching tm_max /
    tk_max / stream_dtype) skips the per-call pad/cast HBM pass entirely.
    """
    n = adj.shape[0]
    assert adj.shape == (n, n), adj.shape
    _, _, _, _, n_rows, n_cols = _choose_tiling(n, tm_max, tk_max)
    return jnp.pad(adj.astype(stream_dtype),
                   ((0, n_rows - n), (0, n_cols - n)))


def _make_gcn_kernel(*, s_resident: bool, tk: int,
                     has_epilogue_w: bool, has_bias: bool):
    def kernel(*refs):
        i = 0
        adj_ref = refs[i]; i += 1                      # (TM, TK) streamed adj tile (bf16)
        s_ref = refs[i]; i += 1                        # rhs: resident (NC, SW) or streamed (TK, SW)
        w_ref = refs[i] if has_epilogue_w else None
        i += int(has_epilogue_w)                       # (SW, FO) resident weight (f32)
        b_ref = refs[i] if has_bias else None
        i += int(has_bias)                             # (1, FO)  resident bias (f32)
        o_ref = refs[i]; i += 1                        # (TM, FO) output tile (f32)
        acc_ref = refs[i]                              # (TM, SW) f32 accumulator scratch

        k = pl.program_id(1)

        @pl.when(k == 0)
        def _init():
            acc_ref[...] = jnp.zeros_like(acc_ref)

        if s_resident:
            # rhs is fully VMEM-resident; slice the current K window.
            off = pl.multiple_of(k * tk, 128)
            s_tile = s_ref[pl.ds(off, tk), :]
        else:
            s_tile = s_ref[...]

        # Big (N x N) matmul contribution: bf16 inputs, f32 accumulate on MXU.
        acc_ref[...] += jnp.dot(adj_ref[...], s_tile,
                                preferred_element_type=jnp.float32)

        @pl.when(k == pl.num_programs(1) - 1)
        def _finalize():
            out = acc_ref[...]
            if has_epilogue_w:
                # (adj @ x) @ w -- small per-row-tile epilogue matmul in f32.
                out = jnp.dot(out, w_ref[...],
                              preferred_element_type=jnp.float32)
            if has_bias:
                out = out + b_ref[...]
            o_ref[...] = out.astype(o_ref.dtype)

    return kernel


def graph_convolution(x, weight, adj, bias=None, *,
                      tm_max: int = 1024, tk_max: int = 2048,
                      stream_dtype=jnp.bfloat16,
                      s_resident_max_bytes: int = 16 << 20):
    """Pallas GCN layer forward: adj @ (x @ weight) + bias.

    `adj` may be either the raw (N, N) dense adjacency or the padded / cast
    array returned by prepare_adjacency() (preferred: reused across layers so
    the pad+bf16-cast HBM pass happens only once).
    """
    n_nodes, f_in = x.shape
    f_in2, f_out = weight.shape
    assert f_in == f_in2, (f_in, f_in2)
    assert adj.shape[0] >= n_nodes and adj.shape[1] >= n_nodes, adj.shape

    x = x.astype(jnp.float32)
    weight = weight.astype(jnp.float32)

    s_item = jnp.dtype(stream_dtype).itemsize
    f_in_pad = _round_up(f_in, 128)
    f_out_pad = _round_up(f_out, 128)
    # Stream the narrower of {x, x@w} through the N^2 matmul.
    has_epilogue_w = f_in_pad < f_out_pad
    s_width = f_in_pad if has_epilogue_w else f_out_pad
    has_bias = bias is not None

    budget = _vmem_budget_bytes()
    target = budget - (8 << 20)        # headroom for compiler-internal scratch

    # Pick tiles; shrink them (and/or drop rhs residency) if the VMEM estimate
    # would not fit this generation's budget.
    eff_tm_max, eff_tk_max = tm_max, tk_max
    while True:
        tm, tk, m_tiles, k_tiles, n_rows, n_cols = _choose_tiling(
            n_nodes, eff_tm_max, eff_tk_max)
        base = (2 * tm * tk * s_item             # adj tiles, double-buffered
                + 2 * tm * f_out_pad * 4         # output tiles, double-buffered
                + tm * s_width * 4)              # f32 accumulator scratch
        if has_epilogue_w:
            base += 2 * s_width * f_out_pad * 4  # resident weight
        if has_bias:
            base += 2 * 8 * f_out_pad * 4        # resident bias
        s_res_bytes = 2 * n_cols * s_width * s_item
        s_str_bytes = 2 * tk * s_width * s_item
        s_resident = s_res_bytes <= s_resident_max_bytes
        vmem_needed = base + (s_res_bytes if s_resident else s_str_bytes)
        if s_resident and vmem_needed > target and base + s_str_bytes <= target:
            s_resident = False
            vmem_needed = base + s_str_bytes
        if vmem_needed <= target or (eff_tm_max <= 128 and eff_tk_max <= 128):
            break
        if eff_tk_max >= eff_tm_max and eff_tk_max > 128:
            eff_tk_max = max(128, eff_tk_max // 2)
        else:
            eff_tm_max = max(128, eff_tm_max // 2)

    grid = (m_tiles, k_tiles)

    # Adjacency: fast path when already padded/cast via prepare_adjacency().
    if adj.dtype == jnp.dtype(stream_dtype) and adj.shape == (n_rows, n_cols):
        adj_p = adj
    else:
        a = adj[:n_rows, :n_cols]      # clamps; valid data lives in [:N, :N]
        adj_p = jnp.pad(a.astype(stream_dtype),
                        ((0, n_rows - a.shape[0]), (0, n_cols - a.shape[1])))

    # rhs for the big matmul (+ optionally the resident weight for the epilogue).
    if has_epilogue_w:
        s_full = x
        w_p = jnp.pad(weight, ((0, f_in_pad - f_in), (0, f_out_pad - f_out)))
    else:
        # Hoisted small matmul: support = x @ w computed once, outside the grid.
        s_full = jnp.dot(x, weight, preferred_element_type=jnp.float32)
        w_p = None
    s_p = jnp.pad(s_full, ((0, n_cols - n_nodes),
                           (0, s_width - s_full.shape[1]))).astype(stream_dtype)

    inputs = [adj_p]
    in_specs = [pl.BlockSpec((tm, tk), lambda m, k: (m, k))]

    inputs.append(s_p)
    if s_resident:
        # Constant block index -> fetched once, stays VMEM-resident; the kernel
        # slices the (tk, s_width) window with pl.ds (no per-row-tile re-stream).
        in_specs.append(pl.BlockSpec((n_cols, s_width), lambda m, k: (0, 0)))
    else:
        in_specs.append(pl.BlockSpec((tk, s_width), lambda m, k: (k, 0)))

    if has_epilogue_w:
        inputs.append(w_p)
        in_specs.append(pl.BlockSpec((s_width, f_out_pad), lambda m, k: (0, 0)))
    if has_bias:
        bias_p = jnp.pad(bias.astype(jnp.float32).reshape(1, f_out),
                         ((0, 0), (0, f_out_pad - f_out)))
        inputs.append(bias_p)
        in_specs.append(pl.BlockSpec((1, f_out_pad), lambda m, k: (0, 0)))

    vmem_limit = int(min(vmem_needed + (16 << 20), budget))

    flops = 2 * n_rows * n_cols * s_width
    if has_epilogue_w:
        flops += 2 * n_rows * s_width * f_out_pad
    s_passes = 1 if s_resident else m_tiles
    bytes_accessed = (n_rows * n_cols * s_item
                      + n_cols * s_width * s_item * s_passes
                      + n_rows * f_out_pad * 4)
    if has_epilogue_w:
        bytes_accessed += s_width * f_out_pad * 4
    if has_bias:
        bytes_accessed += f_out_pad * 4

    kernel = _make_gcn_kernel(s_resident=s_resident, tk=tk,
                              has_epilogue_w=has_epilogue_w, has_bias=has_bias)

    out_p = pl.pallas_call(
        kernel,
        out_shape=jax.ShapeDtypeStruct((n_rows, f_out_pad), jnp.float32),
        grid_spec=pltpu.PrefetchScalarGridSpec(
            num_scalar_prefetch=0,
            grid=grid,
            in_specs=in_specs,
            out_specs=pl.BlockSpec((tm, f_out_pad), lambda m, k: (m, 0)),
            scratch_shapes=[pltpu.VMEM((tm, s_width), jnp.float32)],
        ),
        compiler_params=pltpu.CompilerParams(
            dimension_semantics=("parallel", "arbitrary"),
            vmem_limit_bytes=vmem_limit,
        ),
        cost_estimate=pl.CostEstimate(
            flops=int(flops), transcendentals=0,
            bytes_accessed=int(bytes_accessed)),
    )(*inputs)

    return out_p[:n_nodes, :f_out]


def init_params(key, in_features, out_features, bias=True):
    """Mirror of reset_parameters(): uniform(-stdv, stdv), stdv = 1/sqrt(out_features)."""
    stdv = 1.0 / math.sqrt(out_features)
    k_w, k_b = jax.random.split(key)
    weight = jax.random.uniform(
        k_w, (in_features, out_features), jnp.float32, minval=-stdv, maxval=stdv)
    b = None
    if bias:
        b = jax.random.uniform(
            k_b, (out_features,), jnp.float32, minval=-stdv, maxval=stdv)
    return weight, b


if __name__ == "__main__":
    key = jax.random.PRNGKey(0)
    k_x, k_adj, k_p1, k_p2, k_p3 = jax.random.split(key, 5)

    N = 16                               # number of graph nodes
    f_in, f_hidden, f_out2, f_wide = 8, 32, 8, 256

    # Node features.
    x = jax.random.normal(k_x, (N, f_in), jnp.float32)

    # Row-normalized dense adjacency (stand-in for the sparse adj of spmm).
    a = jax.random.uniform(k_adj, (N, N), jnp.float32)
    a = (a > 0.7).astype(jnp.float32)
    adj = a + a.T + jnp.eye(N, dtype=jnp.float32)
    adj = adj / jnp.sum(adj, axis=1, keepdims=True)

    # Pad + bf16-cast the adjacency ONCE and reuse it across all layers.
    adj_p = prepare_adjacency(adj)

    # Layer 1: f_out_pad == f_in_pad -> hoisted support = x @ w, resident rhs; bias fused.
    w1, b1 = init_params(k_p1, f_in, f_hidden, bias=True)
    h1 = jax.block_until_ready(graph_convolution(x, w1, adj_p, b1))
    ref1 = adj @ (x @ w1) + b1[None, :]
    assert h1.shape == (N, f_hidden)
    assert jnp.allclose(h1, ref1, atol=3e-2, rtol=3e-2), float(jnp.max(jnp.abs(h1 - ref1)))

    # Layer 2: bias=None -> bias-free kernel variant, reusing the same padded adj.
    w2, _ = init_params(k_p2, f_hidden, f_out2, bias=False)
    h2 = jax.block_until_ready(graph_convolution(ref1, w2, adj_p, None))
    ref2 = adj @ (ref1 @ w2)
    assert h2.shape == (N, f_out2)
    assert jnp.allclose(h2, ref2, atol=3e-2, rtol=3e-2), float(jnp.max(jnp.abs(h2 - ref2)))

    # Layer 3: f_in_pad < f_out_pad -> adj @ x streamed, weight applied in the
    # per-row-tile epilogue; exercised with both resident and streamed rhs paths.
    w3, b3 = init_params(k_p3, f_in, f_wide, bias=True)
    ref3 = adj @ (x @ w3) + b3[None, :]
    h3 = jax.block_until_ready(graph_convolution(x, w3, adj_p, b3))
    assert h3.shape == (N, f_wide)
    assert jnp.allclose(h3, ref3, atol=3e-2, rtol=3e-2), float(jnp.max(jnp.abs(h3 - ref3)))
    h3s = jax.block_until_ready(
        graph_convolution(x, w3, adj_p, b3, s_resident_max_bytes=0))
    assert jnp.allclose(h3s, ref3, atol=3e-2, rtol=3e-2), float(jnp.max(jnp.abs(h3s - ref3)))

    print("KERNEL_OK")
</pallas_src>

<mosaic_0001>
module attributes {stable_mosaic.version = 11 : i64} {
  func.func @kernel(%arg0: i32, %arg1: i32, %arg2: memref<64x128xbf16, #tpu.memory_space<vmem>>, %arg3: memref<128x128xbf16, #tpu.memory_space<vmem>>, %arg4: memref<1x128xf32, #tpu.memory_space<vmem>>, %arg5: memref<64x128xf32, #tpu.memory_space<vmem>>, %arg6: memref<64x128xf32, #tpu.memory_space<vmem>>) attributes {dimension_semantics = [#tpu.dimension_semantics<parallel>, #tpu.dimension_semantics<arbitrary>], iteration_bounds = array<i64: 1, 1>, scalar_prefetch = 0 : i64, scratch_operands = 1 : i64, tpu.core_type = #tpu.core_type<tc>, window_params = [{transform_indices = @transform_0, window_bounds = array<i64: 64, 128>}, {pipeline_mode = #tpu.pipeline_mode<synchronous>, transform_indices = @transform_1, window_bounds = array<i64: 128, 128>}, {pipeline_mode = #tpu.pipeline_mode<synchronous>, transform_indices = @transform_2, window_bounds = array<i64: 1, 128>}, {transform_indices = @transform_3, window_bounds = array<i64: 64, 128>}]} {
    %c0_i32 = arith.constant 0 : i32
    %0 = arith.cmpi eq, %arg1, %c0_i32 : i32
    %1 = arith.extui %0 : i1 to i32
    %c0_i32_0 = arith.constant 0 : i32
    %2 = arith.cmpi ne, %1, %c0_i32_0 : i32
    scf.if %2 {
      %cst_9 = arith.constant 0.000000e+00 : f32
      %15 = vector.broadcast %cst_9 : f32 to vector<64x128xf32>
      %c0_10 = arith.constant 0 : index
      %c0_11 = arith.constant 0 : index
      %16 = vector.load %arg6[%c0_10, %c0_11] : memref<64x128xf32, #tpu.memory_space<vmem>>, vector<64x128xf32>
      tpu.vector_store %arg6[%c0_10, %c0_11], %15 {strides = array<i32>} : memref<64x128xf32, #tpu.memory_space<vmem>>, vector<64x128xf32>,
    } else {
    }
    %c128_i32 = arith.constant 128 : i32
    %3 = arith.muli %arg1, %c128_i32 : i32
    %4 = tpu.assume_multiple %3, 128 : i32
    %5 = arith.index_cast %4 : i32 to index
    %c0 = arith.constant 0 : index
    %6 = vector.load %arg3[%5, %c0] : memref<128x128xbf16, #tpu.memory_space<vmem>>, vector<128x128xbf16>
    %c0_1 = arith.constant 0 : index
    %c0_2 = arith.constant 0 : index
    %7 = vector.load %arg6[%c0_1, %c0_2] : memref<64x128xf32, #tpu.memory_space<vmem>>, vector<64x128xf32>
    %c0_3 = arith.constant 0 : index
    %c0_4 = arith.constant 0 : index
    %8 = vector.load %arg2[%c0_3, %c0_4] : memref<64x128xbf16, #tpu.memory_space<vmem>>, vector<64x128xbf16>
    %cst = arith.constant dense<0.000000e+00> : vector<64x128xf32>
    %9 = tpu.matmul %8, %6, %cst {dimension_numbers = #tpu.dot_dimension_numbers<[1], [0], [0], [1], [0, 0, 1, 1], [], []>} : vector<64x128xbf16>, vector<128x128xbf16>, vector<64x128xf32> -> vector<64x128xf32>
    %10 = arith.addf %7, %9 : vector<64x128xf32>
    %c0_5 = arith.constant 0 : index
    %c0_6 = arith.constant 0 : index
    %11 = vector.load %arg6[%c0_5, %c0_6] : memref<64x128xf32, #tpu.memory_space<vmem>>, vector<64x128xf32>
    tpu.vector_store %arg6[%c0_5, %c0_6], %10 {strides = array<i32>} : memref<64x128xf32, #tpu.memory_space<vmem>>, vector<64x128xf32>,
    %c0_i32_7 = arith.constant 0 : i32
    %12 = arith.cmpi eq, %arg1, %c0_i32_7 : i32
    %13 = arith.extui %12 : i1 to i32
    %c0_i32_8 = arith.constant 0 : i32
    %14 = arith.cmpi ne, %13, %c0_i32_8 : i32
    scf.if %14 {
      %c0_9 = arith.constant 0 : index
      %c0_10 = arith.constant 0 : index
      %15 = vector.load %arg6[%c0_9, %c0_10] : memref<64x128xf32, #tpu.memory_space<vmem>>, vector<64x128xf32>
      %c0_11 = arith.constant 0 : index
      %c0_12 = arith.constant 0 : index
      %16 = vector.load %arg4[%c0_11, %c0_12] : memref<1x128xf32, #tpu.memory_space<vmem>>, vector<1x128xf32>
      %17 = vector.broadcast %16 : vector<1x128xf32> to vector<64x128xf32>
      %18 = arith.addf %15, %17 : vector<64x128xf32>
      %c0_13 = arith.constant 0 : index
      %c0_14 = arith.constant 0 : index
      %19 = vector.load %arg5[%c0_13, %c0_14] : memref<64x128xf32, #tpu.memory_space<vmem>>, vector<64x128xf32>
      tpu.vector_store %arg5[%c0_13, %c0_14], %18 {strides = array<i32>} : memref<64x128xf32, #tpu.memory_space<vmem>>, vector<64x128xf32>,
    } else {
    }
    return
  }
  func.func @transform_0(%arg0: i32, %arg1: i32) -> (i32, i32) {
    %c0_i32 = arith.constant 0 : i32
    return %arg0, %arg1 : i32, i32
  }
  func.func @transform_1(%arg0: i32, %arg1: i32) -> (i32, i32) {
    %c0_i32 = arith.constant 0 : i32
    %c0_i32_0 = arith.constant 0 : i32
    %c0_i32_1 = arith.constant 0 : i32
    return %c0_i32, %c0_i32_0 : i32, i32
  }
  func.func @transform_2(%arg0: i32, %arg1: i32) -> (i32, i32) {
    %c0_i32 = arith.constant 0 : i32
    %c0_i32_0 = arith.constant 0 : i32
    %c0_i32_1 = arith.constant 0 : i32
    return %c0_i32, %c0_i32_0 : i32, i32
  }
  func.func @transform_3(%arg0: i32, %arg1: i32) -> (i32, i32) {
    %c0_i32 = arith.constant 0 : i32
    %c0_i32_0 = arith.constant 0 : i32
    return %arg0, %c0_i32 : i32, i32
  }
}

</mosaic_0001>

<bundles_post_ra>
// kernel: tpu_custom_call.1
= control target key start
LH: loop header
LB: loop body
LE: loop exit
PB: predicated region body
PF: predicated region fallthrough
CT: control target
= control target key end

     0   :  { %8 = vsyncpa [#allocation4], 0  ;;  %s475_s0 = inlined_call_operand.hbm [shape: bf16[64,128], index: 0, kind: input, shape index: {}]   ;;  %s476_s1 = inlined_call_operand.hbm [shape: bf16[128,128], index: 1, kind: input, shape index: {}]   ;;  %s477_s2 = inlined_call_operand.vmem [shape: f32[1,128], index: 2, kind: input, shape index: {}]   ;;  %s478_s3 = inlined_call_operand.hbm [shape: f32[64,128], index: 3, kind: output, shape index: {}]  }
   0x1   :  { %9 = vsyncpa [#allocation7], 0 }
   0x2   :  { %10 = vsyncpa [#allocation5], 0  ;;  %s15_s14 = sshll.u32 %s475_s0, 4  ;;  %s436_s15 = smov [#allocation3]   ;;  %s16_s14 = int_to_ptr.hbm [resolvable:$true] %s15_s14 }
   0x3   :  { %s17_s16 = sshll.u32 %s436_s15, 4  ;;  %s28_s19 = sshll.u32 %s476_s1, 4  ;;  %s18_s16 = int_to_ptr.vmem [resolvable:$true] %s17_s16  ;;  %s29_s19 = int_to_ptr.hbm [resolvable:$true] %s28_s19 }
   0x4   :  { %s437_s20 = smov 64   ;;  %s438_s21 = smov 4  }
   0x5   :  { %23 = dma.hbm_to_vmem [thread:$0]  %s16_s14, 512, %s18_s16, [#allocation4], %s437_s20, %s437_s20, %s438_s21  }
   0x6   :  { %s439_s22 = smov [#allocation6]  }
   0x7   :  { %s30_s23 = sshll.u32 %s439_s22, 4  ;;  %s31_s23 = int_to_ptr.vmem [resolvable:$true] %s30_s23 }
   0x8   :  { %36 = dma.hbm_to_vmem [thread:$0]  %s29_s19, 1024, %s31_s23, [#allocation7], %s437_s20, %s437_s20, %s438_s21  }
   0x9   :  { %430 = dma.done.wait [#allocation4], 512  }
   0xa   :  { %431 = vsyncadd [#allocation4], 4294966784 }
   0xb   :  { %432 = dma.done.wait [#allocation7], 1024  }
   0xc   :  { %433 = vsyncadd [#allocation7], 4294966272  ;;  %v321_v0 = vld [vmem:[#allocation6 + $0x38] sm:$0xff]  ;;  %v320_v1 = vld [vmem:[#allocation6 + $0x30] sm:$0xff]  ;;  %s440_s24 = smov [#allocation8]   ;;  %s250_s27 = sshll.u32 %s478_s3, 4  ;;  %s251_s27 = int_to_ptr.hbm [resolvable:$true] %s250_s27 }
   0xd   :  { %168 = vmatpush.bf16.msra.mxu0 %v321_v0  ;;  %326 = vmatpush.bf16.msra.mxu1 %v321_v0  ;;  %v319_v2 = vld [vmem:[#allocation6 + $0x28] sm:$0xff]  ;;  %v318_v3 = vld [vmem:[#allocation6 + $0x20] sm:$0xff]  ;;  %v317_v4 = vld [vmem:[#allocation6 + $0x18] sm:$0xff]  ;;  %s441_s28 = smov 128   ;;  %s442_s29 = smov 8  }
   0xe   :  { %327 = vmatpush.bf16.msra.mxu2 %v321_v0  ;;  %328 = vmatpush.bf16.msra.mxu3 %v321_v0  ;;  %v316_v5 = vld [vmem:[#allocation6 + $0x10] sm:$0xff]  ;;  %v315_v6 = vld [vmem:[#allocation6 + $0x8] sm:$0xff]  ;;  %v314_v7 = vld [vmem:[#allocation6] sm:$0xff] }
   0xf   :  { %v322_v8 = vld [vmem:[#allocation3] sm:$0xff]  ;;  %v323_v9 = vld [vmem:[#allocation3 + $0x8] sm:$0xff]  ;;  %v324_v10 = vld [vmem:[#allocation3 + $0x10] sm:$0xff] }
  0x10   :  { %v325_v11 = vld [vmem:[#allocation3 + $0x18] sm:$0xff]  ;;  %v357_v12 = vld [vmem:[%s477_s2] ss:$0 sm:$0xff]  ;;  %s248_s2 = sshll.u32 %s440_s24, 4  ;;  %s249_s2 = int_to_ptr.vmem [resolvable:$true] %s248_s2 }
  0x11   :  { %169 = vmatpush.bf16.msra.mxu0 %v320_v1  ;;  %329 = vmatpush.bf16.msra.mxu1 %v320_v1 }
  0x12   :  { %330 = vmatpush.bf16.msra.mxu2 %v320_v1  ;;  %331 = vmatpush.bf16.msra.mxu3 %v320_v1 }
  0x15   :  { %170 = vmatpush.bf16.msra.mxu0 %v319_v2  ;;  %332 = vmatpush.bf16.msra.mxu1 %v319_v2 }
  0x16   :  { %333 = vmatpush.bf16.msra.mxu2 %v319_v2  ;;  %334 = vmatpush.bf16.msra.mxu3 %v319_v2 }
  0x19   :  { %171 = vmatpush.bf16.msra.mxu0 %v318_v3  ;;  %335 = vmatpush.bf16.msra.mxu1 %v318_v3 }
  0x1a   :  { %336 = vmatpush.bf16.msra.mxu2 %v318_v3  ;;  %337 = vmatpush.bf16.msra.mxu3 %v318_v3 }
  0x1d   :  { %172 = vmatpush.bf16.msra.mxu0 %v317_v4  ;;  %338 = vmatpush.bf16.msra.mxu1 %v317_v4 }
  0x1e   :  { %339 = vmatpush.bf16.msra.mxu2 %v317_v4  ;;  %340 = vmatpush.bf16.msra.mxu3 %v317_v4 }
  0x21   :  { %173 = vmatpush.bf16.msra.mxu0 %v316_v5  ;;  %341 = vmatpush.bf16.msra.mxu1 %v316_v5 }
  0x22   :  { %342 = vmatpush.bf16.msra.mxu2 %v316_v5  ;;  %343 = vmatpush.bf16.msra.mxu3 %v316_v5 }
  0x25   :  { %174 = vmatpush.bf16.msra.mxu0 %v315_v6  ;;  %344 = vmatpush.bf16.msra.mxu1 %v315_v6 }
  0x26   :  { %345 = vmatpush.bf16.msra.mxu2 %v315_v6  ;;  %346 = vmatpush.bf16.msra.mxu3 %v315_v6 }
  0x29   :  { %175 = vmatpush.bf16.msra.mxu0 %v314_v7  ;;  %347 = vmatpush.bf16.msra.mxu1 %v314_v7 }
  0x2a   :  { %348 = vmatpush.bf16.msra.mxu2 %v314_v7  ;;  %349 = vmatpush.bf16.msra.mxu3 %v314_v7 }
  0x2c   :  { %176 = vmatmul.bf16.vlgmr.msra.gmra.mxu0 %v322_v8  ;;  %181 = vmatmul.bf16.vlgmr.msra.gmra.mxu1 %v323_v9 }
  0x2d   :  { %186 = vmatmul.bf16.vlgmr.msra.gmra.mxu2 %v324_v10  ;;  %191 = vmatmul.bf16.vlgmr.msra.gmra.mxu3 %v325_v11 }
  0xa9   :  { %v177_v13 = vpop.f32.mrf.mxu0  ;;  %v182_v14 = vpop.f32.mrf.mxu1 }
  0xaa   :  { %v228_v15 = vadd.f32 %v357_v12, %v177_v13  ;;  %v230_v16 = vadd.f32 %v357_v12, %v182_v14 }
  0xac   :  { %236 = vst [vmem:[#allocation8] sm:$0xff] %v228_v15 }
  0xad   :  { %238 = vst [vmem:[#allocation8 + $0x10] sm:$0xff] %v230_v16 }
  0xb0   :  { %v187_v17 = vpop.f32.mrf.mxu2  ;;  %v192_v18 = vpop.f32.mrf.mxu3 }
  0xb1   :  { %v232_v19 = vadd.f32 %v357_v12, %v187_v17  ;;  %v234_v20 = vadd.f32 %v357_v12, %v192_v18  ;;  %v179_v21 = vpop.f32.mrf.mxu0  ;;  %v184_v22 = vpop.f32.mrf.mxu1 }
  0xb2   :  { %v229_v23 = vadd.f32 %v357_v12, %v179_v21  ;;  %v231_v24 = vadd.f32 %v357_v12, %v184_v22 }
  0xb3   :  { %240 = vst [vmem:[#allocation8 + $0x20] sm:$0xff] %v232_v19 }
  0xb4   :  { %242 = vst [vmem:[#allocation8 + $0x30] sm:$0xff] %v234_v20 }
  0xb5   :  { %237 = vst [vmem:[#allocation8 + $0x8] sm:$0xff] %v229_v23 }
  0xb6   :  { %239 = vst [vmem:[#allocation8 + $0x18] sm:$0xff] %v231_v24 }
  0xb8   :  { %v189_v25 = vpop.f32.mrf.mxu2  ;;  %v194_v26 = vpop.f32.mrf.mxu3 }
  0xb9   :  { %v233_v27 = vadd.f32 %v357_v12, %v189_v25  ;;  %v235_v28 = vadd.f32 %v357_v12, %v194_v26 }
  0xbb   :  { %241 = vst [vmem:[#allocation8 + $0x28] sm:$0xff] %v233_v27 }
  0xbc   :  { %243 = vst [vmem:[#allocation8 + $0x38] sm:$0xff] %v235_v28 }
  0xbd   :  { %256 = dma.vmem_to_hbm [thread:$0]  %s249_s2, 1024, %s251_s27, [#allocation5], %s441_s28, %s441_s28, %s442_s29  }
  0xbe   :  { %434 = dma.done.wait [#allocation5], 1024  }
  0xbf   :  { %435 = vsyncadd [#allocation5], 4294966272 }
  0xc0   :  { %261 = vsyncpa [#allocation4], 1 }
  0xc1   :  { %262 = vsyncpa [#allocation7], 1 }
  0xc2   :  { %263 = vsyncpa [#allocation5], 1 }

</bundles_post_ra>
